<compile_context>
chip_gen: v5e
topology: v5e:2x2
jax: 0.10.0
libtpu: 0.0.40
codegen_flags: <defaults>
</compile_context>

<pallas_src>
import functools

import jax
import jax.numpy as jnp
from jax.experimental import pallas as pl
from jax.experimental.pallas import tpu as pltpu

EPS = 1e-5


def _rmsnorm(x, g):
    ms = jnp.mean(x * x, axis=-1, keepdims=True)
    return (x * jax.lax.rsqrt(ms + EPS)) * g


# -------------------- fused block kernel (one invocation per batch element) ---------
def fused_block_kernel(x_ref, ag_ref, wq_ref, wk_ref, wv_ref,
                       cq_ref, sq_ref, ck_ref, sk_ref,
                       wo_ref, fg_ref, w1_ref, w3_ref, w2_ref,
                       o_ref, *, n_heads, n_kv_heads, head_dim):
    hd = head_dim
    hd2 = hd // 2
    n_rep = n_heads // n_kv_heads
    dq2 = n_heads * hd2
    dk2 = n_kv_heads * hd2
    scale = 1.0 / (hd ** 0.5)
    bf16 = jnp.bfloat16
    f32 = jnp.float32

    x = x_ref[0]                                        # (S, D) f32
    S = x.shape[0]

    # ---- RMSNorm + QKV projections (bf16 on the MXU, f32 accumulation) ----
    xn = _rmsnorm(x, ag_ref[...]).astype(bf16)
    q = jnp.dot(xn, wq_ref[...], preferred_element_type=f32)   # (S, Dq)  [evens | odds]
    k = jnp.dot(xn, wk_ref[...], preferred_element_type=f32)   # (S, Dkv) [evens | odds]
    v = jnp.dot(xn, wv_ref[...], preferred_element_type=f32)   # (S, Dkv) original layout

    # ---- RoPE as an elementwise complex multiply in the de-interleaved layout.
    #      Softmax scale folded into q here (O(S*hd) multiplies, not O(S*S)). ----
    q_e, q_o = q[:, :dq2], q[:, dq2:]
    k_e, k_o = k[:, :dk2], k[:, dk2:]
    cq, sq = cq_ref[...], sq_ref[...]
    ck, sk = ck_ref[...], sk_ref[...]
    q_re = (q_e * cq - q_o * sq) * scale
    q_ro = (q_e * sq + q_o * cq) * scale
    k_re = k_e * ck - k_o * sk
    k_ro = k_e * sk + k_o * ck

    # ---- causal attention (everything stays in VMEM) ----
    row = jax.lax.broadcasted_iota(jnp.int32, (S, S), 0)
    col = jax.lax.broadcasted_iota(jnp.int32, (S, S), 1)
    causal = col <= row

    outs = []
    for g in range(n_kv_heads):                         # K/V sliced once per GQA group
        khe_t = k_re[:, g * hd2:(g + 1) * hd2].T.astype(bf16)   # (hd2, S)
        kho_t = k_ro[:, g * hd2:(g + 1) * hd2].T.astype(bf16)
        vh = v[:, g * hd:(g + 1) * hd].astype(bf16)             # (S, hd)
        for r in range(n_rep):                          # shared K/V reused n_rep times
            h = g * n_rep + r
            qhe = q_re[:, h * hd2:(h + 1) * hd2].astype(bf16)
            qho = q_ro[:, h * hd2:(h + 1) * hd2].astype(bf16)
            s = (jnp.dot(qhe, khe_t, preferred_element_type=f32)
                 + jnp.dot(qho, kho_t, preferred_element_type=f32))
            s = jnp.where(causal, s, -jnp.inf)
            m = jnp.max(s, axis=-1, keepdims=True)
            e = jnp.exp(s - m)
            p = e * pl.reciprocal(jnp.sum(e, axis=-1, keepdims=True), approx=True)
            outs.append(jnp.dot(p.astype(bf16), vh, preferred_element_type=f32))
    attn = jnp.concatenate(outs, axis=-1)               # (S, D) lane-dense, f32

    # ---- output projection + residual + FFN RMSNorm + SwiGLU + residual ----
    h = x + jnp.dot(attn.astype(bf16), wo_ref[...], preferred_element_type=f32)
    hn = _rmsnorm(h, fg_ref[...]).astype(bf16)
    u1 = jnp.dot(hn, w1_ref[...], preferred_element_type=f32)
    u3 = jnp.dot(hn, w3_ref[...], preferred_element_type=f32)
    gated = ((u1 * jax.nn.sigmoid(u1)) * u3).astype(bf16)
    o_ref[0] = h + jnp.dot(gated, w2_ref[...], preferred_element_type=f32)


# -------------------- block forward (Pallas wrapper) --------------------
def llm_block_forward(x, p, cos, sin, n_heads, n_kv_heads):
    B, S, D = x.shape
    hd = D // n_heads
    hd2 = hd // 2

    # One-time weight-column permutation: within each head, put all even (real)
    # dims first, then all odd (imag) dims -> RoPE needs no in-kernel swap/permute.
    def deinterleave_perm(n_h):
        ev = [h * hd + 2 * i for h in range(n_h) for i in range(hd2)]
        od = [h * hd + 2 * i + 1 for h in range(n_h) for i in range(hd2)]
        return jnp.asarray(ev + od, dtype=jnp.int32)

    wq_p = p["wq"][:, deinterleave_perm(n_heads)].astype(jnp.bfloat16)
    wk_p = p["wk"][:, deinterleave_perm(n_kv_heads)].astype(jnp.bfloat16)
    wv_b = p["wv"].astype(jnp.bfloat16)
    wo_b = p["wo"].astype(jnp.bfloat16)
    w1_b = p["w1"].astype(jnp.bfloat16)
    w3_b = p["w3"].astype(jnp.bfloat16)
    w2_b = p["w2"].astype(jnp.bfloat16)

    # Compact per-head RoPE tables, tiled across heads (half the width of the old ones).
    cos_q = jnp.tile(cos, (1, n_heads))
    sin_q = jnp.tile(sin, (1, n_heads))
    cos_k = jnp.tile(cos, (1, n_kv_heads))
    sin_k = jnp.tile(sin, (1, n_kv_heads))

    ag = p["attn_norm"].reshape(1, D)
    fg = p["ffn_norm"].reshape(1, D)

    kernel = functools.partial(fused_block_kernel, n_heads=n_heads,
                               n_kv_heads=n_kv_heads, head_dim=hd)

    def full(a):
        nd = a.ndim
        return pl.BlockSpec(a.shape, lambda b, _nd=nd: (0,) * _nd)

    return pl.pallas_call(
        kernel,
        grid=(B,),
        in_specs=[
            pl.BlockSpec((1, S, D), lambda b: (b, 0, 0)),
            full(ag), full(wq_p), full(wk_p), full(wv_b),
            full(cos_q), full(sin_q), full(cos_k), full(sin_k),
            full(wo_b), full(fg), full(w1_b), full(w3_b), full(w2_b),
        ],
        out_specs=pl.BlockSpec((1, S, D), lambda b: (b, 0, 0)),
        out_shape=jax.ShapeDtypeStruct((B, S, D), jnp.float32),
        compiler_params=pltpu.CompilerParams(dimension_semantics=("parallel",)),
    )(x, ag, wq_p, wk_p, wv_b, cos_q, sin_q, cos_k, sin_k, wo_b, fg, w1_b, w3_b, w2_b)


# -------------------- pure-JAX reference (mirrors the PyTorch code, f32) ------------
def ref_forward(x, p, cos, sin, n_heads, n_kv_heads):
    B, S, D = x.shape
    hd = D // n_heads
    n_rep = n_heads // n_kv_heads

    xn = _rmsnorm(x, p["attn_norm"])
    q = xn @ p["wq"]
    k = xn @ p["wk"]
    v = xn @ p["wv"]
    q = q.reshape(B, S, n_heads, hd)
    k = k.reshape(B, S, n_kv_heads, hd)
    v = v.reshape(B, S, n_kv_heads, hd)

    def rope(t):
        te = t[..., 0::2]
        to = t[..., 1::2]
        c = cos[None, :, None, :]
        s = sin[None, :, None, :]
        re = te * c - to * s
        im = te * s + to * c
        return jnp.stack([re, im], axis=-1).reshape(t.shape)

    q = rope(q)
    k = rope(k)
    k = jnp.repeat(k, n_rep, axis=2)
    v = jnp.repeat(v, n_rep, axis=2)
    q = q.transpose(0, 2, 1, 3)
    k = k.transpose(0, 2, 1, 3)
    v = v.transpose(0, 2, 1, 3)

    scores = jnp.einsum("bhqd,bhkd->bhqk", q, k) / (hd ** 0.5)
    row = jnp.arange(S)[:, None]
    col = jnp.arange(S)[None, :]
    mask = jnp.where(col > row, -jnp.inf, 0.0)
    attn = jax.nn.softmax(scores + mask, axis=-1)
    out = jnp.einsum("bhqk,bhkd->bhqd", attn, v)
    out = out.transpose(0, 2, 1, 3).reshape(B, S, D)

    h = x + out @ p["wo"]
    hn = _rmsnorm(h, p["ffn_norm"])
    return h + (jax.nn.silu(hn @ p["w1"]) * (hn @ p["w3"])) @ p["w2"]


if __name__ == "__main__":
    B, S, D = 2, 8, 32
    n_heads, n_kv_heads = 4, 2
    hd = D // n_heads
    multiple_of = 64
    hidden = int(2 * (4 * D) / 3)
    hidden = multiple_of * ((hidden + multiple_of - 1) // multiple_of)  # 128

    key = jax.random.PRNGKey(0)
    ks = jax.random.split(key, 8)
    init = lambda k, shp: 0.05 * jax.random.normal(k, shp, dtype=jnp.float32)
    # Linear weights stored as (in, out), i.e. already transposed vs torch (out, in).
    params = {
        "attn_norm": jnp.ones((D,), jnp.float32),
        "ffn_norm": jnp.ones((D,), jnp.float32),
        "wq": init(ks[0], (D, n_heads * hd)),
        "wk": init(ks[1], (D, n_kv_heads * hd)),
        "wv": init(ks[2], (D, n_kv_heads * hd)),
        "wo": init(ks[3], (D, D)),
        "w1": init(ks[4], (D, hidden)),
        "w2": init(ks[5], (hidden, D)),
        "w3": init(ks[6], (D, hidden)),
    }
    x = jax.random.normal(ks[7], (B, S, D), dtype=jnp.float32)

    # pos_cis (complex in torch) represented by its cos / sin parts, (S, hd//2)
    theta = 10000.0
    inv_freq = 1.0 / (theta ** (jnp.arange(0, hd, 2, dtype=jnp.float32) / hd))
    ang = jnp.outer(jnp.arange(S, dtype=jnp.float32), inv_freq)
    cos, sin = jnp.cos(ang), jnp.sin(ang)

    out = llm_block_forward(x, params, cos, sin, n_heads, n_kv_heads)
    out = jax.block_until_ready(out)

    ref = ref_forward(x, params, cos, sin, n_heads, n_kv_heads)
    max_err = float(jnp.max(jnp.abs(out - ref)))
    assert max_err < 1e-2, f"max abs error {max_err}"
    print("KERNEL_OK")
</pallas_src>

<mosaic_0001>
module attributes {stable_mosaic.version = 11 : i64} {
  func.func @fused_block_kernel(%arg0: i32, %arg1: memref<1x8x32xf32, #tpu.memory_space<vmem>>, %arg2: memref<1x32xf32, #tpu.memory_space<vmem>>, %arg3: memref<32x32xbf16, #tpu.memory_space<vmem>>, %arg4: memref<32x16xbf16, #tpu.memory_space<vmem>>, %arg5: memref<32x16xbf16, #tpu.memory_space<vmem>>, %arg6: memref<8x16xf32, #tpu.memory_space<vmem>>, %arg7: memref<8x16xf32, #tpu.memory_space<vmem>>, %arg8: memref<8x8xf32, #tpu.memory_space<vmem>>, %arg9: memref<8x8xf32, #tpu.memory_space<vmem>>, %arg10: memref<32x32xbf16, #tpu.memory_space<vmem>>, %arg11: memref<1x32xf32, #tpu.memory_space<vmem>>, %arg12: memref<32x128xbf16, #tpu.memory_space<vmem>>, %arg13: memref<32x128xbf16, #tpu.memory_space<vmem>>, %arg14: memref<128x32xbf16, #tpu.memory_space<vmem>>, %arg15: memref<1x8x32xf32, #tpu.memory_space<vmem>>) attributes {dimension_semantics = [#tpu.dimension_semantics<parallel>], iteration_bounds = array<i64: 2>, scalar_prefetch = 0 : i64, scratch_operands = 0 : i64, tpu.core_type = #tpu.core_type<tc>, window_params = [{transform_indices = @transform_0, window_bounds = array<i64: 1, 8, 32>}, {pipeline_mode = #tpu.pipeline_mode<synchronous>, transform_indices = @transform_1, window_bounds = array<i64: 1, 32>}, {pipeline_mode = #tpu.pipeline_mode<synchronous>, transform_indices = @transform_2, window_bounds = array<i64: 32, 32>}, {pipeline_mode = #tpu.pipeline_mode<synchronous>, transform_indices = @transform_3, window_bounds = array<i64: 32, 16>}, {pipeline_mode = #tpu.pipeline_mode<synchronous>, transform_indices = @transform_4, window_bounds = array<i64: 32, 16>}, {pipeline_mode = #tpu.pipeline_mode<synchronous>, transform_indices = @transform_5, window_bounds = array<i64: 8, 16>}, {pipeline_mode = #tpu.pipeline_mode<synchronous>, transform_indices = @transform_6, window_bounds = array<i64: 8, 16>}, {pipeline_mode = #tpu.pipeline_mode<synchronous>, transform_indices = @transform_7, window_bounds = array<i64: 8, 8>}, {pipeline_mode = #tpu.pipeline_mode<synchronous>, transform_indices = @transform_8, window_bounds = array<i64: 8, 8>}, {pipeline_mode = #tpu.pipeline_mode<synchronous>, transform_indices = @transform_9, window_bounds = array<i64: 32, 32>}, {pipeline_mode = #tpu.pipeline_mode<synchronous>, transform_indices = @transform_10, window_bounds = array<i64: 1, 32>}, {pipeline_mode = #tpu.pipeline_mode<synchronous>, transform_indices = @transform_11, window_bounds = array<i64: 32, 128>}, {pipeline_mode = #tpu.pipeline_mode<synchronous>, transform_indices = @transform_12, window_bounds = array<i64: 32, 128>}, {pipeline_mode = #tpu.pipeline_mode<synchronous>, transform_indices = @transform_13, window_bounds = array<i64: 128, 32>}, {transform_indices = @transform_14, window_bounds = array<i64: 1, 8, 32>}]} {
    %c0 = arith.constant 0 : index
    %c0_0 = arith.constant 0 : index
    %c0_1 = arith.constant 0 : index
    %0 = vector.load %arg1[%c0, %c0_0, %c0_1] : memref<1x8x32xf32, #tpu.memory_space<vmem>>, vector<1x8x32xf32>
    %1 = vector.shape_cast %0 : vector<1x8x32xf32> to vector<8x32xf32>
    %c0_2 = arith.constant 0 : index
    %c0_3 = arith.constant 0 : index
    %2 = vector.load %arg2[%c0_2, %c0_3] : memref<1x32xf32, #tpu.memory_space<vmem>>, vector<1x32xf32>
    %3 = arith.mulf %1, %1 : vector<8x32xf32>
    %cst = arith.constant dense<0.000000e+00> : vector<8xf32>
    %4 = vector.multi_reduction <add>, %3, %cst [1] : vector<8x32xf32> to vector<8xf32>
    %5 = vector.shape_cast %4 : vector<8xf32> to vector<8x1xf32>
    %cst_4 = arith.constant 3.200000e+01 : f32
    %6 = vector.broadcast %cst_4 : f32 to vector<8x1xf32>
    %7 = arith.divf %5, %6 : vector<8x1xf32>
    %cst_5 = arith.constant 9.99999974E-6 : f32
    %8 = vector.broadcast %cst_5 : f32 to vector<8x1xf32>
    %9 = arith.addf %7, %8 : vector<8x1xf32>
    %10 = math.rsqrt %9 : vector<8x1xf32>
    %11 = vector.broadcast %10 : vector<8x1xf32> to vector<8x32xf32>
    %12 = arith.mulf %1, %11 : vector<8x32xf32>
    %13 = vector.broadcast %2 : vector<1x32xf32> to vector<8x32xf32>
    %14 = arith.mulf %12, %13 : vector<8x32xf32>
    %15 = arith.truncf %14 : vector<8x32xf32> to vector<8x32xbf16>
    %c0_6 = arith.constant 0 : index
    %c0_7 = arith.constant 0 : index
    %16 = vector.load %arg3[%c0_6, %c0_7] : memref<32x32xbf16, #tpu.memory_space<vmem>>, vector<32x32xbf16>
    %cst_8 = arith.constant dense<0.000000e+00> : vector<8x32xf32>
    %17 = tpu.matmul %15, %16, %cst_8 {dimension_numbers = #tpu.dot_dimension_numbers<[1], [0], [0], [1], [0, 0, 1, 1], [], []>} : vector<8x32xbf16>, vector<32x32xbf16>, vector<8x32xf32> -> vector<8x32xf32>
    %c0_9 = arith.constant 0 : index
    %c0_10 = arith.constant 0 : index
    %18 = vector.load %arg4[%c0_9, %c0_10] : memref<32x16xbf16, #tpu.memory_space<vmem>>, vector<32x16xbf16>
    %cst_11 = arith.constant dense<0.000000e+00> : vector<8x16xf32>
    %19 = tpu.matmul %15, %18, %cst_11 {dimension_numbers = #tpu.dot_dimension_numbers<[1], [0], [0], [1], [0, 0, 1, 1], [], []>} : vector<8x32xbf16>, vector<32x16xbf16>, vector<8x16xf32> -> vector<8x16xf32>
    %c0_12 = arith.constant 0 : index
    %c0_13 = arith.constant 0 : index
    %20 = vector.load %arg5[%c0_12, %c0_13] : memref<32x16xbf16, #tpu.memory_space<vmem>>, vector<32x16xbf16>
    %cst_14 = arith.constant dense<0.000000e+00> : vector<8x16xf32>
    %21 = tpu.matmul %15, %20, %cst_14 {dimension_numbers = #tpu.dot_dimension_numbers<[1], [0], [0], [1], [0, 0, 1, 1], [], []>} : vector<8x32xbf16>, vector<32x16xbf16>, vector<8x16xf32> -> vector<8x16xf32>
    %22 = vector.extract_strided_slice %17 {offsets = [0, 0], sizes = [8, 16], strides = [1, 1]} : vector<8x32xf32> to vector<8x16xf32>
    %23 = vector.extract_strided_slice %17 {offsets = [0, 16], sizes = [8, 16], strides = [1, 1]} : vector<8x32xf32> to vector<8x16xf32>
    %24 = vector.extract_strided_slice %19 {offsets = [0, 0], sizes = [8, 8], strides = [1, 1]} : vector<8x16xf32> to vector<8x8xf32>
    %25 = vector.extract_strided_slice %19 {offsets = [0, 8], sizes = [8, 8], strides = [1, 1]} : vector<8x16xf32> to vector<8x8xf32>
    %c0_15 = arith.constant 0 : index
    %c0_16 = arith.constant 0 : index
    %26 = vector.load %arg6[%c0_15, %c0_16] : memref<8x16xf32, #tpu.memory_space<vmem>>, vector<8x16xf32>
    %c0_17 = arith.constant 0 : index
    %c0_18 = arith.constant 0 : index
    %27 = vector.load %arg7[%c0_17, %c0_18] : memref<8x16xf32, #tpu.memory_space<vmem>>, vector<8x16xf32>
    %c0_19 = arith.constant 0 : index
    %c0_20 = arith.constant 0 : index
    %28 = vector.load %arg8[%c0_19, %c0_20] : memref<8x8xf32, #tpu.memory_space<vmem>>, vector<8x8xf32>
    %c0_21 = arith.constant 0 : index
    %c0_22 = arith.constant 0 : index
    %29 = vector.load %arg9[%c0_21, %c0_22] : memref<8x8xf32, #tpu.memory_space<vmem>>, vector<8x8xf32>
    %30 = arith.mulf %22, %26 : vector<8x16xf32>
    %31 = arith.mulf %23, %27 : vector<8x16xf32>
    %32 = arith.subf %30, %31 : vector<8x16xf32>
    %cst_23 = arith.constant 0.353553385 : f32
    %33 = vector.broadcast %cst_23 : f32 to vector<8x16xf32>
    %34 = arith.mulf %32, %33 : vector<8x16xf32>
    %35 = arith.mulf %22, %27 : vector<8x16xf32>
    %36 = arith.mulf %23, %26 : vector<8x16xf32>
    %37 = arith.addf %35, %36 : vector<8x16xf32>
    %cst_24 = arith.constant 0.353553385 : f32
    %38 = vector.broadcast %cst_24 : f32 to vector<8x16xf32>
    %39 = arith.mulf %37, %38 : vector<8x16xf32>
    %40 = arith.mulf %24, %28 : vector<8x8xf32>
    %41 = arith.mulf %25, %29 : vector<8x8xf32>
    %42 = arith.subf %40, %41 : vector<8x8xf32>
    %43 = arith.mulf %24, %29 : vector<8x8xf32>
    %44 = arith.mulf %25, %28 : vector<8x8xf32>
    %45 = arith.addf %43, %44 : vector<8x8xf32>
    %46 = tpu.iota {dimensions = array<i32: 0>} : vector<8x8xi32>
    %47 = tpu.iota {dimensions = array<i32: 1>} : vector<8x8xi32>
    %48 = arith.cmpi sle, %47, %46 : vector<8x8xi32>
    %49 = vector.extract_strided_slice %42 {offsets = [0, 0], sizes = [8, 4], strides = [1, 1]} : vector<8x8xf32> to vector<8x4xf32>
    %50 = tpu.transpose %49, [1, 0] : vector<8x4xf32> -> vector<4x8xf32>
    %51 = arith.truncf %50 : vector<4x8xf32> to vector<4x8xbf16>
    %52 = vector.extract_strided_slice %45 {offsets = [0, 0], sizes = [8, 4], strides = [1, 1]} : vector<8x8xf32> to vector<8x4xf32>
    %53 = tpu.transpose %52, [1, 0] : vector<8x4xf32> -> vector<4x8xf32>
    %54 = arith.truncf %53 : vector<4x8xf32> to vector<4x8xbf16>
    %55 = vector.extract_strided_slice %21 {offsets = [0, 0], sizes = [8, 8], strides = [1, 1]} : vector<8x16xf32> to vector<8x8xf32>
    %56 = arith.truncf %55 : vector<8x8xf32> to vector<8x8xbf16>
    %57 = vector.extract_strided_slice %34 {offsets = [0, 0], sizes = [8, 4], strides = [1, 1]} : vector<8x16xf32> to vector<8x4xf32>
    %58 = arith.truncf %57 : vector<8x4xf32> to vector<8x4xbf16>
    %59 = vector.extract_strided_slice %39 {offsets = [0, 0], sizes = [8, 4], strides = [1, 1]} : vector<8x16xf32> to vector<8x4xf32>
    %60 = arith.truncf %59 : vector<8x4xf32> to vector<8x4xbf16>
    %cst_25 = arith.constant dense<0.000000e+00> : vector<8x8xf32>
    %61 = tpu.matmul %58, %51, %cst_25 {dimension_numbers = #tpu.dot_dimension_numbers<[1], [0], [0], [1], [0, 0, 1, 1], [], []>} : vector<8x4xbf16>, vector<4x8xbf16>, vector<8x8xf32> -> vector<8x8xf32>
    %cst_26 = arith.constant dense<0.000000e+00> : vector<8x8xf32>
    %62 = tpu.matmul %60, %54, %cst_26 {dimension_numbers = #tpu.dot_dimension_numbers<[1], [0], [0], [1], [0, 0, 1, 1], [], []>} : vector<8x4xbf16>, vector<4x8xbf16>, vector<8x8xf32> -> vector<8x8xf32>
    %63 = arith.addf %61, %62 : vector<8x8xf32>
    %cst_27 = arith.constant 0xFF800000 : f32
    %64 = vector.broadcast %cst_27 : f32 to vector<8x8xf32>
    %65 = arith.select %48, %63, %64 : vector<8x8xi1>, vector<8x8xf32>
    %cst_28 = arith.constant dense<0xFF800000> : vector<8xf32>
    %66 = vector.multi_reduction <maximumf>, %65, %cst_28 [1] : vector<8x8xf32> to vector<8xf32>
    %67 = vector.shape_cast %66 : vector<8xf32> to vector<8x1xf32>
    %68 = vector.broadcast %67 : vector<8x1xf32> to vector<8x8xf32>
    %69 = arith.subf %65, %68 : vector<8x8xf32>
    %70 = math.exp %69 : vector<8x8xf32>
    %cst_29 = arith.constant dense<0.000000e+00> : vector<8xf32>
    %71 = vector.multi_reduction <add>, %70, %cst_29 [1] : vector<8x8xf32> to vector<8xf32>
    %72 = vector.shape_cast %71 : vector<8xf32> to vector<8x1xf32>
    %73 = tpu.reciprocal %72 {approx = true} : vector<8x1xf32> -> vector<8x1xf32>
    %74 = vector.broadcast %73 : vector<8x1xf32> to vector<8x8xf32>
    %75 = arith.mulf %70, %74 : vector<8x8xf32>
    %76 = arith.truncf %75 : vector<8x8xf32> to vector<8x8xbf16>
    %cst_30 = arith.constant dense<0.000000e+00> : vector<8x8xf32>
    %77 = tpu.matmul %76, %56, %cst_30 {dimension_numbers = #tpu.dot_dimension_numbers<[1], [0], [0], [1], [0, 0, 1, 1], [], []>} : vector<8x8xbf16>, vector<8x8xbf16>, vector<8x8xf32> -> vector<8x8xf32>
    %78 = vector.extract_strided_slice %34 {offsets = [0, 4], sizes = [8, 4], strides = [1, 1]} : vector<8x16xf32> to vector<8x4xf32>
    %79 = arith.truncf %78 : vector<8x4xf32> to vector<8x4xbf16>
    %80 = vector.extract_strided_slice %39 {offsets = [0, 4], sizes = [8, 4], strides = [1, 1]} : vector<8x16xf32> to vector<8x4xf32>
    %81 = arith.truncf %80 : vector<8x4xf32> to vector<8x4xbf16>
    %cst_31 = arith.constant dense<0.000000e+00> : vector<8x8xf32>
    %82 = tpu.matmul %79, %51, %cst_31 {dimension_numbers = #tpu.dot_dimension_numbers<[1], [0], [0], [1], [0, 0, 1, 1], [], []>} : vector<8x4xbf16>, vector<4x8xbf16>, vector<8x8xf32> -> vector<8x8xf32>
    %cst_32 = arith.constant dense<0.000000e+00> : vector<8x8xf32>
    %83 = tpu.matmul %81, %54, %cst_32 {dimension_numbers = #tpu.dot_dimension_numbers<[1], [0], [0], [1], [0, 0, 1, 1], [], []>} : vector<8x4xbf16>, vector<4x8xbf16>, vector<8x8xf32> -> vector<8x8xf32>
    %84 = arith.addf %82, %83 : vector<8x8xf32>
    %cst_33 = arith.constant 0xFF800000 : f32
    %85 = vector.broadcast %cst_33 : f32 to vector<8x8xf32>
    %86 = arith.select %48, %84, %85 : vector<8x8xi1>, vector<8x8xf32>
    %cst_34 = arith.constant dense<0xFF800000> : vector<8xf32>
    %87 = vector.multi_reduction <maximumf>, %86, %cst_34 [1] : vector<8x8xf32> to vector<8xf32>
    %88 = vector.shape_cast %87 : vector<8xf32> to vector<8x1xf32>
    %89 = vector.broadcast %88 : vector<8x1xf32> to vector<8x8xf32>
    %90 = arith.subf %86, %89 : vector<8x8xf32>
    %91 = math.exp %90 : vector<8x8xf32>
    %cst_35 = arith.constant dense<0.000000e+00> : vector<8xf32>
    %92 = vector.multi_reduction <add>, %91, %cst_35 [1] : vector<8x8xf32> to vector<8xf32>
    %93 = vector.shape_cast %92 : vector<8xf32> to vector<8x1xf32>
    %94 = tpu.reciprocal %93 {approx = true} : vector<8x1xf32> -> vector<8x1xf32>
    %95 = vector.broadcast %94 : vector<8x1xf32> to vector<8x8xf32>
    %96 = arith.mulf %91, %95 : vector<8x8xf32>
    %97 = arith.truncf %96 : vector<8x8xf32> to vector<8x8xbf16>
    %cst_36 = arith.constant dense<0.000000e+00> : vector<8x8xf32>
    %98 = tpu.matmul %97, %56, %cst_36 {dimension_numbers = #tpu.dot_dimension_numbers<[1], [0], [0], [1], [0, 0, 1, 1], [], []>} : vector<8x8xbf16>, vector<8x8xbf16>, vector<8x8xf32> -> vector<8x8xf32>
    %99 = vector.extract_strided_slice %42 {offsets = [0, 4], sizes = [8, 4], strides = [1, 1]} : vector<8x8xf32> to vector<8x4xf32>
    %100 = tpu.transpose %99, [1, 0] : vector<8x4xf32> -> vector<4x8xf32>
    %101 = arith.truncf %100 : vector<4x8xf32> to vector<4x8xbf16>
    %102 = vector.extract_strided_slice %45 {offsets = [0, 4], sizes = [8, 4], strides = [1, 1]} : vector<8x8xf32> to vector<8x4xf32>
    %103 = tpu.transpose %102, [1, 0] : vector<8x4xf32> -> vector<4x8xf32>
    %104 = arith.truncf %103 : vector<4x8xf32> to vector<4x8xbf16>
    %105 = vector.extract_strided_slice %21 {offsets = [0, 8], sizes = [8, 8], strides = [1, 1]} : vector<8x16xf32> to vector<8x8xf32>
    %106 = arith.truncf %105 : vector<8x8xf32> to vector<8x8xbf16>
    %107 = vector.extract_strided_slice %34 {offsets = [0, 8], sizes = [8, 4], strides = [1, 1]} : vector<8x16xf32> to vector<8x4xf32>
    %108 = arith.truncf %107 : vector<8x4xf32> to vector<8x4xbf16>
    %109 = vector.extract_strided_slice %39 {offsets = [0, 8], sizes = [8, 4], strides = [1, 1]} : vector<8x16xf32> to vector<8x4xf32>
    %110 = arith.truncf %109 : vector<8x4xf32> to vector<8x4xbf16>
    %cst_37 = arith.constant dense<0.000000e+00> : vector<8x8xf32>
    %111 = tpu.matmul %108, %101, %cst_37 {dimension_numbers = #tpu.dot_dimension_numbers<[1], [0], [0], [1], [0, 0, 1, 1], [], []>} : vector<8x4xbf16>, vector<4x8xbf16>, vector<8x8xf32> -> vector<8x8xf32>
    %cst_38 = arith.constant dense<0.000000e+00> : vector<8x8xf32>
    %112 = tpu.matmul %110, %104, %cst_38 {dimension_numbers = #tpu.dot_dimension_numbers<[1], [0], [0], [1], [0, 0, 1, 1], [], []>} : vector<8x4xbf16>, vector<4x8xbf16>, vector<8x8xf32> -> vector<8x8xf32>
    %113 = arith.addf %111, %112 : vector<8x8xf32>
    %cst_39 = arith.constant 0xFF800000 : f32
    %114 = vector.broadcast %cst_39 : f32 to vector<8x8xf32>
    %115 = arith.select %48, %113, %114 : vector<8x8xi1>, vector<8x8xf32>
    %cst_40 = arith.constant dense<0xFF800000> : vector<8xf32>
    %116 = vector.multi_reduction <maximumf>, %115, %cst_40 [1] : vector<8x8xf32> to vector<8xf32>
    %117 = vector.shape_cast %116 : vector<8xf32> to vector<8x1xf32>
    %118 = vector.broadcast %117 : vector<8x1xf32> to vector<8x8xf32>
    %119 = arith.subf %115, %118 : vector<8x8xf32>
    %120 = math.exp %119 : vector<8x8xf32>
    %cst_41 = arith.constant dense<0.000000e+00> : vector<8xf32>
    %121 = vector.multi_reduction <add>, %120, %cst_41 [1] : vector<8x8xf32> to vector<8xf32>
    %122 = vector.shape_cast %121 : vector<8xf32> to vector<8x1xf32>
    %123 = tpu.reciprocal %122 {approx = true} : vector<8x1xf32> -> vector<8x1xf32>
    %124 = vector.broadcast %123 : vector<8x1xf32> to vector<8x8xf32>
    %125 = arith.mulf %120, %124 : vector<8x8xf32>
    %126 = arith.truncf %125 : vector<8x8xf32> to vector<8x8xbf16>
    %cst_42 = arith.constant dense<0.000000e+00> : vector<8x8xf32>
    %127 = tpu.matmul %126, %106, %cst_42 {dimension_numbers = #tpu.dot_dimension_numbers<[1], [0], [0], [1], [0, 0, 1, 1], [], []>} : vector<8x8xbf16>, vector<8x8xbf16>, vector<8x8xf32> -> vector<8x8xf32>
    %128 = vector.extract_strided_slice %34 {offsets = [0, 12], sizes = [8, 4], strides = [1, 1]} : vector<8x16xf32> to vector<8x4xf32>
    %129 = arith.truncf %128 : vector<8x4xf32> to vector<8x4xbf16>
    %130 = vector.extract_strided_slice %39 {offsets = [0, 12], sizes = [8, 4], strides = [1, 1]} : vector<8x16xf32> to vector<8x4xf32>
    %131 = arith.truncf %130 : vector<8x4xf32> to vector<8x4xbf16>
    %cst_43 = arith.constant dense<0.000000e+00> : vector<8x8xf32>
    %132 = tpu.matmul %129, %101, %cst_43 {dimension_numbers = #tpu.dot_dimension_numbers<[1], [0], [0], [1], [0, 0, 1, 1], [], []>} : vector<8x4xbf16>, vector<4x8xbf16>, vector<8x8xf32> -> vector<8x8xf32>
    %cst_44 = arith.constant dense<0.000000e+00> : vector<8x8xf32>
    %133 = tpu.matmul %131, %104, %cst_44 {dimension_numbers = #tpu.dot_dimension_numbers<[1], [0], [0], [1], [0, 0, 1, 1], [], []>} : vector<8x4xbf16>, vector<4x8xbf16>, vector<8x8xf32> -> vector<8x8xf32>
    %134 = arith.addf %132, %133 : vector<8x8xf32>
    %cst_45 = arith.constant 0xFF800000 : f32
    %135 = vector.broadcast %cst_45 : f32 to vector<8x8xf32>
    %136 = arith.select %48, %134, %135 : vector<8x8xi1>, vector<8x8xf32>
    %cst_46 = arith.constant dense<0xFF800000> : vector<8xf32>
    %137 = vector.multi_reduction <maximumf>, %136, %cst_46 [1] : vector<8x8xf32> to vector<8xf32>
    %138 = vector.shape_cast %137 : vector<8xf32> to vector<8x1xf32>
    %139 = vector.broadcast %138 : vector<8x1xf32> to vector<8x8xf32>
    %140 = arith.subf %136, %139 : vector<8x8xf32>
    %141 = math.exp %140 : vector<8x8xf32>
    %cst_47 = arith.constant dense<0.000000e+00> : vector<8xf32>
    %142 = vector.multi_reduction <add>, %141, %cst_47 [1] : vector<8x8xf32> to vector<8xf32>
    %143 = vector.shape_cast %142 : vector<8xf32> to vector<8x1xf32>
    %144 = tpu.reciprocal %143 {approx = true} : vector<8x1xf32> -> vector<8x1xf32>
    %145 = vector.broadcast %144 : vector<8x1xf32> to vector<8x8xf32>
    %146 = arith.mulf %141, %145 : vector<8x8xf32>
    %147 = arith.truncf %146 : vector<8x8xf32> to vector<8x8xbf16>
    %cst_48 = arith.constant dense<0.000000e+00> : vector<8x8xf32>
    %148 = tpu.matmul %147, %106, %cst_48 {dimension_numbers = #tpu.dot_dimension_numbers<[1], [0], [0], [1], [0, 0, 1, 1], [], []>} : vector<8x8xbf16>, vector<8x8xbf16>, vector<8x8xf32> -> vector<8x8xf32>
    %149 = tpu.concatenate %77, %98, %127, %148 in 1 : vector<8x8xf32>, vector<8x8xf32>, vector<8x8xf32>, vector<8x8xf32> -> vector<8x32xf32>
    %150 = arith.truncf %149 : vector<8x32xf32> to vector<8x32xbf16>
    %c0_49 = arith.constant 0 : index
    %c0_50 = arith.constant 0 : index
    %151 = vector.load %arg10[%c0_49, %c0_50] : memref<32x32xbf16, #tpu.memory_space<vmem>>, vector<32x32xbf16>
    %cst_51 = arith.constant dense<0.000000e+00> : vector<8x32xf32>
    %152 = tpu.matmul %150, %151, %cst_51 {dimension_numbers = #tpu.dot_dimension_numbers<[1], [0], [0], [1], [0, 0, 1, 1], [], []>} : vector<8x32xbf16>, vector<32x32xbf16>, vector<8x32xf32> -> vector<8x32xf32>
    %153 = arith.addf %1, %152 : vector<8x32xf32>
    %c0_52 = arith.constant 0 : index
    %c0_53 = arith.constant 0 : index
    %154 = vector.load %arg11[%c0_52, %c0_53] : memref<1x32xf32, #tpu.memory_space<vmem>>, vector<1x32xf32>
    %155 = arith.mulf %153, %153 : vector<8x32xf32>
    %cst_54 = arith.constant dense<0.000000e+00> : vector<8xf32>
    %156 = vector.multi_reduction <add>, %155, %cst_54 [1] : vector<8x32xf32> to vector<8xf32>
    %157 = vector.shape_cast %156 : vector<8xf32> to vector<8x1xf32>
    %cst_55 = arith.constant 3.200000e+01 : f32
    %158 = vector.broadcast %cst_55 : f32 to vector<8x1xf32>
    %159 = arith.divf %157, %158 : vector<8x1xf32>
    %cst_56 = arith.constant 9.99999974E-6 : f32
    %160 = vector.broadcast %cst_56 : f32 to vector<8x1xf32>
    %161 = arith.addf %159, %160 : vector<8x1xf32>
    %162 = math.rsqrt %161 : vector<8x1xf32>
    %163 = vector.broadcast %162 : vector<8x1xf32> to vector<8x32xf32>
    %164 = arith.mulf %153, %163 : vector<8x32xf32>
    %165 = vector.broadcast %154 : vector<1x32xf32> to vector<8x32xf32>
    %166 = arith.mulf %164, %165 : vector<8x32xf32>
    %167 = arith.truncf %166 : vector<8x32xf32> to vector<8x32xbf16>
    %c0_57 = arith.constant 0 : index
    %c0_58 = arith.constant 0 : index
    %168 = vector.load %arg12[%c0_57, %c0_58] : memref<32x128xbf16, #tpu.memory_space<vmem>>, vector<32x128xbf16>
    %cst_59 = arith.constant dense<0.000000e+00> : vector<8x128xf32>
    %169 = tpu.matmul %167, %168, %cst_59 {dimension_numbers = #tpu.dot_dimension_numbers<[1], [0], [0], [1], [0, 0, 1, 1], [], []>} : vector<8x32xbf16>, vector<32x128xbf16>, vector<8x128xf32> -> vector<8x128xf32>
    %c0_60 = arith.constant 0 : index
    %c0_61 = arith.constant 0 : index
    %170 = vector.load %arg13[%c0_60, %c0_61] : memref<32x128xbf16, #tpu.memory_space<vmem>>, vector<32x128xbf16>
    %cst_62 = arith.constant dense<0.000000e+00> : vector<8x128xf32>
    %171 = tpu.matmul %167, %170, %cst_62 {dimension_numbers = #tpu.dot_dimension_numbers<[1], [0], [0], [1], [0, 0, 1, 1], [], []>} : vector<8x32xbf16>, vector<32x128xbf16>, vector<8x128xf32> -> vector<8x128xf32>
    %172 = arith.negf %169 : vector<8x128xf32>
    %173 = math.exp %172 : vector<8x128xf32>
    %cst_63 = arith.constant 1.000000e+00 : f32
    %174 = vector.broadcast %cst_63 : f32 to vector<8x128xf32>
    %175 = arith.addf %174, %173 : vector<8x128xf32>
    %176 = arith.divf %174, %175 : vector<8x128xf32>
    %177 = arith.mulf %169, %176 : vector<8x128xf32>
    %178 = arith.mulf %177, %171 : vector<8x128xf32>
    %179 = arith.truncf %178 : vector<8x128xf32> to vector<8x128xbf16>
    %c0_64 = arith.constant 0 : index
    %c0_65 = arith.constant 0 : index
    %180 = vector.load %arg14[%c0_64, %c0_65] : memref<128x32xbf16, #tpu.memory_space<vmem>>, vector<128x32xbf16>
    %cst_66 = arith.constant dense<0.000000e+00> : vector<8x32xf32>
    %181 = tpu.matmul %179, %180, %cst_66 {dimension_numbers = #tpu.dot_dimension_numbers<[1], [0], [0], [1], [0, 0, 1, 1], [], []>} : vector<8x128xbf16>, vector<128x32xbf16>, vector<8x32xf32> -> vector<8x32xf32>
    %182 = arith.addf %153, %181 : vector<8x32xf32>
    %c0_67 = arith.constant 0 : index
    %c0_68 = arith.constant 0 : index
    %c0_69 = arith.constant 0 : index
    %183 = vector.load %arg15[%c0_67, %c0_68, %c0_69] : memref<1x8x32xf32, #tpu.memory_space<vmem>>, vector<1x8x32xf32>
    %184 = vector.shape_cast %183 : vector<1x8x32xf32> to vector<8x32xf32>
    %185 = vector.shape_cast %182 : vector<8x32xf32> to vector<1x8x32xf32>
    tpu.vector_store %arg15[%c0_67, %c0_68, %c0_69], %185 {strides = array<i32>} : memref<1x8x32xf32, #tpu.memory_space<vmem>>, vector<1x8x32xf32>,
    return
  }
  func.func @transform_0(%arg0: i32) -> (i32, i32, i32) {
    %c0_i32 = arith.constant 0 : i32
    %c0_i32_0 = arith.constant 0 : i32
    %c0_i32_1 = arith.constant 0 : i32
    return %arg0, %c0_i32, %c0_i32_0 : i32, i32, i32
  }
  func.func @transform_1(%arg0: i32) -> (i32, i32) {
    %c0_i32 = arith.constant 0 : i32
    %c0_i32_0 = arith.constant 0 : i32
    %c0_i32_1 = arith.constant 0 : i32
    return %c0_i32, %c0_i32_0 : i32, i32
  }
  func.func @transform_2(%arg0: i32) -> (i32, i32) {
    %c0_i32 = arith.constant 0 : i32
    %c0_i32_0 = arith.constant 0 : i32
    %c0_i32_1 = arith.constant 0 : i32
    return %c0_i32, %c0_i32_0 : i32, i32
  }
  func.func @transform_3(%arg0: i32) -> (i32, i32) {
    %c0_i32 = arith.constant 0 : i32
    %c0_i32_0 = arith.constant 0 : i32
    %c0_i32_1 = arith.constant 0 : i32
    return %c0_i32, %c0_i32_0 : i32, i32
  }
  func.func @transform_4(%arg0: i32) -> (i32, i32) {
    %c0_i32 = arith.constant 0 : i32
    %c0_i32_0 = arith.constant 0 : i32
    %c0_i32_1 = arith.constant 0 : i32
    return %c0_i32, %c0_i32_0 : i32, i32
  }
  func.func @transform_5(%arg0: i32) -> (i32, i32) {
    %c0_i32 = arith.constant 0 : i32
    %c0_i32_0 = arith.constant 0 : i32
    %c0_i32_1 = arith.constant 0 : i32
    return %c0_i32, %c0_i32_0 : i32, i32
  }
  func.func @transform_6(%arg0: i32) -> (i32, i32) {
    %c0_i32 = arith.constant 0 : i32
    %c0_i32_0 = arith.constant 0 : i32
    %c0_i32_1 = arith.constant 0 : i32
    return %c0_i32, %c0_i32_0 : i32, i32
  }
  func.func @transform_7(%arg0: i32) -> (i32, i32) {
    %c0_i32 = arith.constant 0 : i32
    %c0_i32_0 = arith.constant 0 : i32
    %c0_i32_1 = arith.constant 0 : i32
    return %c0_i32, %c0_i32_0 : i32, i32
  }
  func.func @transform_8(%arg0: i32) -> (i32, i32) {
    %c0_i32 = arith.constant 0 : i32
    %c0_i32_0 = arith.constant 0 : i32
    %c0_i32_1 = arith.constant 0 : i32
    return %c0_i32, %c0_i32_0 : i32, i32
  }
  func.func @transform_9(%arg0: i32) -> (i32, i32) {
    %c0_i32 = arith.constant 0 : i32
    %c0_i32_0 = arith.constant 0 : i32
    %c0_i32_1 = arith.constant 0 : i32
    return %c0_i32, %c0_i32_0 : i32, i32
  }
  func.func @transform_10(%arg0: i32) -> (i32, i32) {
    %c0_i32 = arith.constant 0 : i32
    %c0_i32_0 = arith.constant 0 : i32
    %c0_i32_1 = arith.constant 0 : i32
    return %c0_i32, %c0_i32_0 : i32, i32
  }
  func.func @transform_11(%arg0: i32) -> (i32, i32) {
    %c0_i32 = arith.constant 0 : i32
    %c0_i32_0 = arith.constant 0 : i32
    %c0_i32_1 = arith.constant 0 : i32
    return %c0_i32, %c0_i32_0 : i32, i32
  }
  func.func @transform_12(%arg0: i32) -> (i32, i32) {
    %c0_i32 = arith.constant 0 : i32
    %c0_i32_0 = arith.constant 0 : i32
    %c0_i32_1 = arith.constant 0 : i32
    return %c0_i32, %c0_i32_0 : i32, i32
  }
  func.func @transform_13(%arg0: i32) -> (i32, i32) {
    %c0_i32 = arith.constant 0 : i32
    %c0_i32_0 = arith.constant 0 : i32
    %c0_i32_1 = arith.constant 0 : i32
    return %c0_i32, %c0_i32_0 : i32, i32
  }
  func.func @transform_14(%arg0: i32) -> (i32, i32, i32) {
    %c0_i32 = arith.constant 0 : i32
    %c0_i32_0 = arith.constant 0 : i32
    %c0_i32_1 = arith.constant 0 : i32
    return %arg0, %c0_i32, %c0_i32_0 : i32, i32, i32
  }
}

</mosaic_0001>

<bundles_post_ra>
// kernel: tpu_custom_call.1
= control target key start
LH: loop header
LB: loop body
LE: loop exit
PB: predicated region body
PF: predicated region fallthrough
CT: control target
= control target key end

     0   :  { %19 = vsyncpa [#allocation3], 0  ;;  %s2161_s0 = inlined_call_operand.vmem [shape: f32[2,8,32], index: 0, kind: input, shape index: {}]   ;;  %s2162_s1 = inlined_call_operand.hbm [shape: f32[1,32], index: 1, kind: input, shape index: {}]   ;;  %s2163_s2 = inlined_call_operand.vmem [shape: bf16[32,32], index: 2, kind: input, shape index: {}]   ;;  %s2164_s3 = inlined_call_operand.vmem [shape: bf16[32,16], index: 3, kind: input, shape index: {}]   ;;  %s2165_s4 = inlined_call_operand.vmem [shape: bf16[32,16], index: 4, kind: input, shape index: {}]   ;;  %s2166_s5 = inlined_call_operand.vmem [shape: f32[8,16], index: 5, kind: input, shape index: {}]   ;;  %s2167_s6 = inlined_call_operand.vmem [shape: f32[8,16], index: 6, kind: input, shape index: {}]   ;;  %s2168_s7 = inlined_call_operand.vmem [shape: f32[8,8], index: 7, kind: input, shape index: {}]   ;;  %s2169_s8 = inlined_call_operand.hbm [shape: f32[8,8], index: 8, kind: input, shape index: {}]   ;;  %s2170_s9 = inlined_call_operand.vmem [shape: bf16[32,32], index: 9, kind: input, shape index: {}]   ;;  %s2171_s10 = inlined_call_operand.vmem [shape: f32[1,32], index: 10, kind: input, shape index: {}]   ;;  %s2172_s11 = inlined_call_operand.vmem [shape: bf16[32,128], index: 11, kind: input, shape index: {}]   ;;  %s2173_s12 = inlined_call_operand.vmem [shape: bf16[32,128], index: 12, kind: input, shape index: {}]   ;;  %s2174_s13 = inlined_call_operand.vmem [shape: bf16[128,32], index: 13, kind: input, shape index: {}]   ;;  %s2175_s14 = inlined_call_operand.hbm [shape: f32[2,8,32], index: 14, kind: output, shape index: {}]  }
   0x1   :  { %20 = vsyncpa [#allocation6], 0 }
   0x2   :  { %21 = vsyncpa [#allocation4], 0 }
   0x3   :  { %23 = vsyncpa [#allocation4 + $0x1], 0  ;;  %s1877_s29 = smov 0   ;;  %s1879_s30 = smov 0  }
   0x4   :  { %s1881_s15 = smov 0   ;;  %s1883_s16 = smov 0  }
   0x5 LB: > { %2180 = sst [smem:[#allocation11_spill]] %s1786_s15  ;;  %s1898_s17 = sadd.s32 4294967295, %s1790_s16   ;;  %s1790_s16 = sphi %s1883_s16, %s2188_s16   ;;  %s1786_s15 = sphi %s1881_s15, %s2190_s15   ;;  %s1782_s30 = sphi %s1879_s30, %s2192_s30   ;;  %s1778_s29 = sphi %s1877_s29, %s2191_s29  }
   0x6   : > { %s1430_s18 = sadd.s32 4294967294, %s1790_s16   ;;  %s1902_s19 = sadd.s32 1, %s1790_s16  }
   0x7   : > { %2181 = sst [smem:[#allocation12_spill]] %s1902_s19  ;;  %s335_s20 = sadd.s32 1, %s1786_s15 }
   0x8   : > { %s332_s21 = ssub.s32 %s1790_s16, %s1902_s19  ;;  %p345_p0 = scmp.ne.s32.totalorder %s1786_s15, %s1782_s30 }
   0x9   : > { %p333_p1 = scmp.eq.s32.totalorder %s332_s21, 0  ;;  %p346_p2 = scmp.eq.s32.totalorder %s1898_s17, 1 }
   0xa   : > { %p351_p3 = scmp.ne.s32.totalorder %s1782_s30, %s1778_s29  ;;  %p352_p4 = scmp.eq.s32.totalorder %s1430_s18, 1 }
   0xb   : > { %s1913_s22 = scalar_select %p333_p1, %s1786_s15, %s335_s20  }
   0xc   : > { %p1915_p5 = por %p346_p2, %p345_p0  ;;  %p1919_p6 = por %p352_p4, %p351_p3 }
   0xd   : > { %2182 = sst [smem:[#allocation13_spill]] %s1913_s22  ;;  %p1431_p7 = scmp.ge.s32.totalorder %s1790_s16, 1 }
   0xe   : > { %s2184_s24 = scalar_select %p1919_p6, 1, 0 }
   0xf   : > { %p359_p8 = scmp.lt.s32.totalorder %s1790_s16, 3  ;;  %p1584_p9 = scmp.eq.s32.totalorder %s1898_s17, 0 }
  0x10   : > { %2185 = sst [smem:[#allocation14_spill]] %s2184_s24  ;;  %s371_s28 = sshll.u32 %s2162_s1, 4  ;;  %s372_s28 = int_to_ptr.hbm [resolvable:$true] %s371_s28 }
  0x11   : > { %p1926_p10 = pnand %p1431_p7, %p359_p8  ;;  %s1792_s18 = smov [#allocation2]  }
  0x12   : > { %s373_s20 = sshll.u32 %s1792_s18, 4  ;;  %s401_s15 = sshll.u32 %s2169_s8, 4  ;;  %s374_s20 = int_to_ptr.vmem [resolvable:$true] %s373_s20  ;;  %s402_s15 = int_to_ptr.hbm [resolvable:$true] %s401_s15 }
  0x13   : > { %p1573_p11 = pneg %p1926_p10  ;;  %s1793_s19 = smov [#allocation5]  }
  0x14   : > { %s403_s24 = sshll.u32 %s1793_s19, 4  ;;  %438 = sbr.rel (%p1926_p10) target bundleno = 2381 (0x94d), region = 76  ;;  %s404_s24 = int_to_ptr.vmem [resolvable:$true] %s403_s24 }
  0x15   : > { %p1574_p12 = pnand %p1584_p9, %p1573_p11 }
  0x17   : > { %1576 = dma.hbm_to_vmem [thread:$0]  (!%p1574_p12), %s372_s28, 16, %s374_s20, [#allocation3]  }
  0x18   : > { %1579 = dma.hbm_to_vmem [thread:$0]  (!%p1574_p12), %s402_s15, 128, %s404_s24, [#allocation6]  }
  0x19   : > { %1765 = dma.done.wait (%p1584_p9), [#allocation3], 16  }
  0x1a   : > { %1767 = vsyncadd (%p1584_p9), [#allocation3], 4294967280 }
  0x1b   : > { %1769 = dma.done.wait (%p1584_p9), [#allocation6], 128  }
  0x1c   : > { %1771 = vsyncadd (%p1584_p9), [#allocation6], 4294967168  ;;  %p489_p13 = scmp.lt.s32.totalorder %s1898_s17, 1  ;;  %vm497_vm0 = vcmask 261120   ;;  %v1794_v3 = vmov 32.0   ;;  %v1544_v7 = vld [vmem:[%s2163_s2 + $0x8] sm:$0xff] }
  0x1d   : > { %1634 = vrcp.f32 %v1794_v3  ;;  %v1546_v8 = vld [vmem:[%s2164_s3 + $0x8] sm:$0xff]  ;;  %551 = vmatpush.bf16.msra.mxu0 %v1544_v7  ;;  %v1543_v10 = vld [vmem:[%s2163_s2] sm:$0xff]  ;;  %s1795_s27 = smov 16   ;;  %s1796_s22 = smov 8   ;;  %vm797_vm5 = vcmask 1043456   ;;  %vm744_vm6 = vcmask 1041408  }
  0x1e   : > { %s490_s19 = scalar_select %p489_p13, %s1898_s17, 1  ;;  %580 = vmatpush.bf16.msra.mxu2 %v1546_v8  ;;  %v1545_v11 = vld [vmem:[%s2164_s3] sm:$0xff]  ;;  %v1548_v14 = vld [vmem:[%s2165_s4 + $0x8] sm:$0xff]  ;;  %vm740_vm7 = vcmask 31744   ;;  %vm781_vm9 = vcmask 64512   ;;  %vm1110_vm10 = vcmask 130048  }
  0x1f   : > { %v1975_v13 = vld [vmem:[%s2167_s6] sm:$0xff]  ;;  %s1797_s24 = smov 112   ;;  %s1799_s26 = smov 124   ;;  %vm1112_vm11 = vcmask 195584  }
  0x20   : > { %s1439_s15 = sshll.u32 %s490_s19, 3  ;;  %622 = vrot.lane.b32.xlu1 %v1975_v13, %s1795_s27  ;;  %v1547_v16 = vld [vmem:[%s2165_s4] sm:$0xff]  ;;  %s1800_s28 = smov 116  }
  0x21   : > { %s492_s25 = scalar_lea.vmem %s2161_s0, %s1439_s15  ;;  %552 = vmatpush.bf16.msra.mxu0 %v1543_v10  ;;  %v616_v20 = vld [vmem:[%s2166_s5] sm:$0xff]  ;;  %s1801_s18 = smov 24  }
  0x22   : > { %v1955_v0 = vld [vmem:[%s492_s25] sm:$0xff]  ;;  %581 = vmatpush.bf16.msra.mxu2 %v1545_v11  ;;  %s1798_s25 = smov 120  }
  0x23   : > { %v496_v1 = vmul.f32 %v1955_v0, %v1955_v0  ;;  %v1635_v4 = vpop.eup %1634  ;;  %v618_v23 = vld [vmem:[%s2168_s7] sm:$0xff] }
  0x24   : > { %v502_v5 = vmul.f32 32.0, %v1635_v4  ;;  %vm506_vm1 = vweird.f32 %v1635_v4  ;;  %v619_v24 = vld [vmem:[#allocation5] sm:$0xff]  ;;  %v1632_v29 = vld [vmem:[#allocation2] ss:$0 sm:$0xff] }
  0x25   : > { %v498_v2 = vsel %vm497_vm0, %v496_v1, 0.0  ;;  %646 = vrot.lane.b32.xlu2 %v619_v24, %s1796_s22 }
  0x26   : > { %499 = vadd.xlane.f32.xlu0 %v498_v2  ;;  %v503_v6 = vsub.f32 1.0, %v502_v5  ;;  %609 = vmatpush.bf16.msrb.mxu2 %v1548_v14 }
  0x28   : > { %v504_v9 = vmul.f32 %v1635_v4, %v503_v6  ;;  %634 = vrot.lane.b32.xlu1 %v616_v20, %s1795_s27 }
  0x2a   : > { %v505_v12 = vadd.f32 %v1635_v4, %v504_v9  ;;  %610 = vmatpush.bf16.msrb.mxu2 %v1547_v16  ;;  %v666_v16 = vlaneseq }
  0x2c   : > { %v1980_v15 = vsel %vm506_vm1, %v1635_v4, %v505_v12 }
  0x3a   : > { %657 = vrot.lane.b32.xlu0 %v618_v23, %s1796_s22 }
  0x7f   : > { %v647_v38 = vpop.permute.xlu2 %646 }
  0x92   : > { %v623_v34 = vpop.permute.xlu1 %622 }
  0x99   : > { %v500_v17 = vpop.xlane.xlu0 %499 }
  0x9a   : > { %v508_v18 = vmul.f32 %v1980_v15, %v500_v17  ;;  %v635_v43 = vpop.permute.xlu1 %634  ;;  %v2020_v17 = vshrl.u32 %v666_v16, 7 }
  0x9c   : > { %v509_v19 = vadd.f32 1e-05, %v508_v18  ;;  %v2022_v18 = vand.u32 127, %v666_v16 }
  0x9e   : > { %1636 = vrsqrt.f32 %v509_v19  ;;  %vm516_vm3 = vweird.f32 %v509_v19  ;;  %vm670_vm8 = vcmp.le.s32.totalorder %v2022_v18, %v2020_v17 }
  0xa4   : > { %v1637_v21 = vpop.eup %1636 }
  0xa5   : > { %v511_v22 = vmul.f32 %v1637_v21, %v509_v19  ;;  %vm517_vm2 = vweird.f32 %v1637_v21 }
  0xa6   : > { %vm518_vm4 = vmor %vm516_vm3, %vm517_vm2 }
  0xa7   : > { %v512_v25 = vmul.f32 %v1637_v21, %v511_v22 }
  0xa9   : > { %v513_v26 = vmul.f32 0.5, %v512_v25 }
  0xab   : > { %v514_v27 = vsub.f32 1.5, %v513_v26 }
  0xac   : > { %v658_v37 = vpop.permute.xlu0 %657 }
  0xad   : > { %v515_v28 = vmul.f32 %v1637_v21, %v514_v27 }
  0xaf   : > { %v519_v30 = vsel %vm518_vm4, %v1637_v21, %v515_v28 }
  0xb0   : > { %v520_v31 = vmul.f32 %v519_v30, %v1955_v0 }
  0xb2   : > { %v524_v32 = vmul.f32 %v1632_v29, %v520_v31 }
  0xb4   : > { %v525_v33 = vpack.c.bf16 %v524_v32, %v524_v32 }
  0xb6   : > { %1448 = vmatmul.msk.bf16.vlgmr.msra.gmra.mxu0 %vm497_vm0, %v525_v33  ;;  %1457 = vmatmul.msk.bf16.vlgmr.msra.gmra.mxu2 %vm497_vm0, %v525_v33 }
  0xc6   : > { %1466 = vmatmul.msk.bf16.vlgmr.msrb.gmra.mxu2 %vm497_vm0, %v525_v33 }
 0x133   : > { %v554_v35 = vpop.f32.mrf.mxu0 }
 0x134   : > { %v625_v36 = vmul.f32 %v623_v34, %v554_v35  ;;  %v637_v45 = vmul.f32 %v635_v43, %v554_v35  ;;  %v632_v53 = vmul.f32 %v1975_v13, %v554_v35  ;;  %v620_v58 = vmul.f32 %v616_v20, %v554_v35 }
 0x136   : > { %627 = vrot.lane.b32.xlu1 %v625_v36, %s1797_s24 }
 0x139   : > { %v583_v39 = vpop.f32.mrf.mxu2 }
 0x13a   : > { %v660_v40 = vmul.f32 %v658_v37, %v583_v39  ;;  %v649_v42 = vmul.f32 %v647_v38, %v583_v39  ;;  %v655_v50 = vmul.f32 %v619_v24, %v583_v39  ;;  %v644_v1 = vmul.f32 %v618_v23, %v583_v39 }
 0x13b   : > { %v556_v41 = vpop.f32.mrf.mxu0 }
 0x13c   : > { %662 = vrot.lane.b32.xlu2 %v660_v40, %s1798_s25 }
 0x13e   : > { %651 = vrot.lane.b32.xlu1 %v649_v42, %s1798_s25 }
 0x141   : > { %v585_v44 = vpop.f32.mrf.mxu2 }
 0x144   : > { %639 = vrot.lane.b32.xlu2 %v637_v45, %s1797_s24 }
 0x149   : > { %v612_v46 = vpop.f32.mrf.mxu2 }
 0x14a   : > { %v2003_v47 = vpack.c.bf16 %v612_v46, %v612_v46 }
 0x14c   : > { %v799_v48 = vsel %vm797_vm5, %v2003_v47, 0 }
 0x14d   : > { %808 = vmatpush.bf16.msrb.mxu0 %v799_v48 }
 0x151   : > { %v614_v49 = vpop.f32.mrf.mxu2 }
 0x196   : > { %v663_v51 = vpop.permute.xlu2 %662 }
 0x197   : > { %v665_v52 = vadd.f32 %v663_v51, %v655_v50 }
 0x199   : > { %704 = vxpose.xlu2.b32.start.end [1/1] (short) (narrow) %v665_v52, 8 }
 0x19e   : > { %v640_v54 = vpop.permute.xlu2 %639 }
 0x19f   : > { %v642_v55 = vadd.f32 %v640_v54, %v632_v53 }
 0x1a1   : > { %v643_v56 = vmul.f32 0.35355338, %v642_v55 }
 0x1a3   : > { %v739_v57 = vpack.c.bf16 %v643_v56, %v643_v56 }
 0x1a5   : > { %815 = vrot.lane.b32.xlu1 %v739_v57, %s1799_s26 }
 0x1a8   : > { %v628_v59 = vpop.permute.xlu1 %627 }
 0x1a9   : > { %v630_v60 = vsub.f32 %v620_v58, %v628_v59 }
 0x1ab   : > { %v631_v61 = vmul.f32 0.35355338, %v630_v60 }
 0x1ad   : > { %v2009_v62 = vpack.c.bf16 %v631_v61, %v631_v61 }
 0x1af   : > { %834 = vrot.lane.b32.xlu0 %v2009_v62, %s1799_s26 }
 0x1b0   : > { %v652_v63 = vpop.permute.xlu1 %651 }
 0x1b1   : > { %v654_v2 = vsub.f32 %v644_v1, %v652_v63 }
 0x1d1   : > { %671 = vxpose.xlu0.b32.start.end [1/1] (short) (narrow) %v654_v2, 8 }
 0x217   : > { %v816_v6 = vpop.permute.xlu1 %815 }
 0x221   : > { %v835_v7 = vpop.permute.xlu0 %834 }
 0x232   : > { %v720_v3 = vpop.trf.xlu2 }
 0x233   : > { %v736_v4 = vpack.c.bf16 %v720_v3, %v720_v3 }
 0x235   : > { %v746_v5 = vsel %vm744_vm6, %v736_v4, 0 }
 0x236   : > { %755 = vmatpush.bf16.msra.mxu3 %v746_v5  ;;  %827 = vmatpush.bf16.msra.mxu1 %v746_v5 }
 0x239   : > { %1467 = vmatmul.msk.bf16.vlgmr.msra.gmra.mxu3 %vm740_vm7, %v739_v57  ;;  %1470 = vmatmul.msk.bf16.vlgmr.msra.gmra.mxu1 %vm740_vm7, %v816_v6 }
 0x275   : > { %v687_v8 = vpop.trf.xlu0 }
 0x276   : > { %v703_v9 = vpack.c.bf16 %v687_v8, %v687_v8 }
 0x278   : > { %v765_v10 = vsel %vm744_vm6, %v703_v9, 0 }
 0x279   : > { %774 = vmatpush.bf16.msrb.mxu3 %v765_v10  ;;  %846 = vmatpush.bf16.msra.mxu2 %v765_v10 }
 0x27c   : > { %1468 = vmatmul.msk.bf16.vlgmr.msrb.gmra.mxu3 %vm740_vm7, %v2009_v62  ;;  %1471 = vmatmul.msk.bf16.vlgmr.msra.gmra.mxu2 %vm740_vm7, %v835_v7 }
 0x27d   : > { %875 = vmatpush.bf16.msra.mxu3 %v799_v48 }
 0x2b6   : > { %v829_v11 = vpop.f32.mrf.mxu1 }
 0x2bc   : > { %v757_v12 = vpop.f32.mrf.mxu3 }
 0x2be   : > { %v831_v13 = vpop.f32.mrf.mxu1 }
 0x2c4   : > { %v759_v14 = vpop.f32.mrf.mxu3 }
 0x2ff   : > { %v776_v19 = vpop.f32.mrf.mxu3  ;;  %v848_v20 = vpop.f32.mrf.mxu2 }
 0x300   : > { %v777_v21 = vadd.f32 %v776_v19, %v757_v12  ;;  %v849_v22 = vadd.f32 %v848_v20, %v829_v11 }
 0x302   : > { %v852_v23 = vsel %vm670_vm8, %v849_v22, -inf  ;;  %v780_v24 = vsel %vm670_vm8, %v777_v21, -inf }
 0x303   : > { %v853_v25 = vsel %vm781_vm9, %v852_v23, -inf  ;;  %v782_v26 = vsel %vm781_vm9, %v780_v24, -inf }
 0x304   : > { %854 = vmax.xlane.f32.xlu2 %v853_v25  ;;  %783 = vmax.xlane.f32.xlu1 %v782_v26 }
 0x307   : > { %v778_v27 = vpop.f32.mrf.mxu3  ;;  %v850_v28 = vpop.f32.mrf.mxu2 }
 0x31c   : > { %976 = vrot.lane.b32.xlu2 %v2009_v62, %s1798_s25 }
 0x31d   : > { %919 = vrot.lane.b32.xlu1 %v665_v52, %s1799_s26 }
 0x325   : > { %882 = vrot.lane.b32.xlu1 %v654_v2, %s1799_s26  ;;  %s486_s26 = sand.u32 1, %s1782_s30  }
 0x326   : > { %s1334_s24 = scalar_lea.sflag [#allocation4], %s486_s26 }
 0x32d   : > { %955 = vrot.lane.b32.xlu1 %v739_v57, %s1798_s25 }
 0x335   : > { %1032 = vrot.lane.b32.xlu1 %v739_v57, %s1800_s28 }
 0x377   : > { %v855_v29 = vpop.xlane.xlu2 %854  ;;  %v784_v30 = vpop.xlane.xlu1 %783 }
 0x378   : > { %v856_v31 = vsub.f32 %v852_v23, %v855_v29  ;;  %v785_v32 = vsub.f32 %v780_v24, %v784_v30 }
 0x37a   : > { %v857_v33 = vmul.f32 1.442695, %v856_v31  ;;  %v786_v34 = vmul.f32 1.442695, %v785_v32 }
 0x37c   : > { %1638 = vpow2.f32 %v857_v33 }
 0x37d   : > { %1640 = vpow2.f32 %v786_v34 }
 0x37f   : > { %v977_v52 = vpop.permute.xlu2 %976 }
 0x382   : > { %v1639_v35 = vpop.eup %1638 }
 0x383   : > { %v1641_v36 = vpop.eup %1640  ;;  %v859_v37 = vsel %vm781_vm9, %v1639_v35, 0.0 }
 0x384   : > { %860 = vadd.xlane.f32.xlu1 %v859_v37  ;;  %v788_v38 = vsel %vm781_vm9, %v1641_v36, 0.0 }
 0x385   : > { %789 = vadd.xlane.f32.xlu0 %v788_v38 }
 0x38f   : > { %v920_v39 = vpop.permute.xlu1 %919 }
 0x397   : > { %v883_v40 = vpop.permute.xlu1 %882 }
 0x398   : > { %885 = vxpose.xlu2.b32.start.end [1/1] (short) (narrow) %v883_v40, 8  ;;  %v1549_v40 = vld [vmem:[%s2170_s9] sm:$0xff] }
 0x399   : > { %1050 = vrot.lane.b32.xlu0 %v2009_v62, %s1800_s28  ;;  %s1540_s28 = sshll.u32 %s1898_s17, 3 }
 0x39a   : > { %s1344_s19 = scalar_lea.hbm %s2175_s14, %s1540_s28 }
 0x39f   : > { %v956_v41 = vpop.permute.xlu1 %955 }
 0x3a7   : > { %v1033_v42 = vpop.permute.xlu1 %1032 }
 0x3be   : > { %922 = vxpose.xlu1.b32.start.end [1/1] (short) (narrow) %v920_v39, 8  ;;  %v1550_v39 = vld [vmem:[%s2170_s9 + $0x8] sm:$0xff] }
 0x3f7   : > { %v861_v43 = vpop.xlane.xlu1 %860 }
 0x3f8   : > { %v790_v44 = vpop.xlane.xlu0 %789  ;;  %1642 = vrcp.f32 %v861_v43 }
 0x3f9   : > { %1644 = vrcp.f32 %v790_v44 }
 0x3fe   : > { %v1643_v45 = vpop.eup %1642 }
 0x3ff   : > { %v1645_v46 = vpop.eup %1644  ;;  %v863_v48 = vmul.f32 %v1643_v45, %v1639_v35 }
 0x400   : > { %v792_v49 = vmul.f32 %v1645_v46, %v1641_v36 }
 0x401   : > { %v864_v50 = vpack.c.bf16 %v863_v48, %v863_v48 }
 0x402   : > { %v793_v51 = vpack.c.bf16 %v792_v49, %v792_v49 }
 0x403   : > { %1472 = vmatmul.msk.bf16.vlgmr.msra.gmra.mxu3 %vm781_vm9, %v864_v50 }
 0x404   : > { %1469 = vmatmul.msk.bf16.vlgmr.msrb.gmra.mxu0 %vm781_vm9, %v793_v51 }
 0x40b   : > { %v1051_v59 = vpop.permute.xlu0 %1050 }
 0x431   : > { %v901_v53 = vpop.trf.xlu2 }
 0x432   : > { %v917_v54 = vpack.c.bf16 %v901_v53, %v901_v53 }
 0x434   : > { %v982_v55 = vsel %vm744_vm6, %v917_v54, 0  ;;  %v1552_v54 = vld [vmem:[%s2172_s11 + $0x8] sm:$0xff] }
 0x435   : > { %991 = vmatpush.bf16.msrb.mxu1 %v982_v55 }
 0x438   : > { %1474 = vmatmul.msk.bf16.vlgmr.msrb.gmra.mxu1 %vm740_vm7, %v977_v52 }
 0x462   : > { %v938_v56 = vpop.trf.xlu1 }
 0x463   : > { %v954_v57 = vpack.c.bf16 %v938_v56, %v938_v56  ;;  %v1553_v56 = vld [vmem:[%s2173_s12] sm:$0xff] }
 0x465   : > { %v961_v58 = vsel %vm744_vm6, %v954_v57, 0 }
 0x466   : > { %970 = vmatpush.bf16.msra.mxu0 %v961_v58  ;;  %1044 = vmatpush.bf16.msrb.mxu3 %v961_v58 }
 0x469   : > { %1473 = vmatmul.msk.bf16.vlgmr.msra.gmra.mxu0 %vm740_vm7, %v956_v41  ;;  %1476 = vmatmul.msk.bf16.vlgmr.msrb.gmra.mxu3 %vm740_vm7, %v1033_v42 }
 0x46a   : > { %1062 = vmatpush.bf16.msrb.mxu0 %v982_v55  ;;  %v1554_v55 = vld [vmem:[%s2173_s12 + $0x8] sm:$0xff]  ;;  %1196 = vmatpush.bf16.msra.mxu3 %v1552_v54 }
 0x46e   : > { %1225 = vmatpush.bf16.msra.mxu0 %v1554_v55 }
 0x472   : > { %1226 = vmatpush.bf16.msra.mxu0 %v1553_v56 }
 0x479   : > { %1477 = vmatmul.msk.bf16.vlgmr.msrb.gmra.mxu0 %vm740_vm7, %v1051_v59 }
 0x481   : > { %v2050_v60 = vpop.f32.mrf.mxu0 }
 0x486   : > { %v877_v61 = vpop.f32.mrf.mxu3 }
 0x489   : > { %v812_v62 = vpop.f32.mrf.mxu0 }
 0x48e   : > { %v879_v63 = vpop.f32.mrf.mxu3 }
 0x4b5   : > { %v993_v1 = vpop.f32.mrf.mxu1 }
 0x4bd   : > { %v995_v2 = vpop.f32.mrf.mxu1 }
 0x4e6   : > { %v972_v3 = vpop.f32.mrf.mxu0 }
 0x4e7   : > { %v994_v4 = vadd.f32 %v993_v1, %v972_v3  ;;  %v1633_v3 = vld [vmem:[%s2171_s10] ss:$0 sm:$0xff] }
 0x4e9   : > { %v997_v5 = vsel %vm670_vm8, %v994_v4, -inf }
 0x4ea   : > { %v998_v6 = vsel %vm781_vm9, %v997_v5, -inf }
 0x4eb   : > { %999 = vmax.xlane.f32.xlu0 %v998_v6 }
 0x4ec   : > { %v1046_v7 = vpop.f32.mrf.mxu3 }
 0x4ee   : > { %v974_v8 = vpop.f32.mrf.mxu0 }
 0x4ef   : > { %v1561_v8 = vld [vmem:[%s2174_s13 + $0x30] sm:$0xff] }
 0x4f4   : > { %v1048_v9 = vpop.f32.mrf.mxu3 }
 0x4f5   : > { %v1560_v9 = vld [vmem:[%s2174_s13 + $0x28] sm:$0xff] }
 0x4f6   : > { %v1064_v10 = vpop.f32.mrf.mxu0 }
 0x4f7   : > { %v1065_v11 = vadd.f32 %v1064_v10, %v1046_v7  ;;  %v1562_v7 = vld [vmem:[%s2174_s13 + $0x38] sm:$0xff]  ;;  %v1559_v10 = vld [vmem:[%s2174_s13 + $0x20] sm:$0xff] }
 0x4f9   : > { %v1068_v12 = vsel %vm670_vm8, %v1065_v11, -inf  ;;  %v1558_v11 = vld [vmem:[%s2174_s13 + $0x18] sm:$0xff] }
 0x4fa   : > { %v1069_v13 = vsel %vm781_vm9, %v1068_v12, -inf }
 0x4fb   : > { %1070 = vmax.xlane.f32.xlu2 %v1069_v13 }
 0x4fe   : > { %v1066_v14 = vpop.f32.mrf.mxu0 }
 0x4ff   : > { %v1556_v14 = vld [vmem:[%s2174_s13 + $0x8] sm:$0xff] }
 0x55e   : > { %v1000_v16 = vpop.xlane.xlu0 %999 }
 0x55f   : > { %v1001_v19 = vsub.f32 %v997_v5, %v1000_v16  ;;  %v1555_v16 = vld [vmem:[%s2174_s13] sm:$0xff] }
 0x561   : > { %v1002_v20 = vmul.f32 1.442695, %v1001_v19 }
 0x563   : > { %1646 = vpow2.f32 %v1002_v20 }
 0x569   : > { %v1647_v21 = vpop.eup %1646 }
 0x56a   : > { %v1004_v22 = vsel %vm781_vm9, %v1647_v21, 0.0 }
 0x56b   : > { %1005 = vadd.xlane.f32.xlu1 %v1004_v22 }
 0x56e   : > { %v1071_v23 = vpop.xlane.xlu2 %1070 }
 0x56f   : > { %v1072_v24 = vsub.f32 %v1068_v12, %v1071_v23  ;;  %v1557_v12 = vld [vmem:[%s2174_s13 + $0x10] sm:$0xff] }
 0x571   : > { %v1073_v25 = vmul.f32 1.442695, %v1072_v24 }
 0x573   : > { %1648 = vpow2.f32 %v1073_v25 }
 0x579   : > { %v1649_v26 = vpop.eup %1648 }
 0x57a   : > { %v1075_v17 = vsel %vm781_vm9, %v1649_v26, 0.0 }
 0x57b   : > { %1076 = vadd.xlane.f32.xlu0 %v1075_v17 }
 0x58f   : > { %1011 = vrot.lane.b32.xlu0 %v2003_v47, %s1798_s25 }
 0x597   : > { %1098 = vrot.lane.b32.xlu0 %v877_v61, %s1796_s22  ;;  %s1348_s22 = sshll.u32 %s1344_s19, 4  ;;  %s1349_s22 = int_to_ptr.hbm [resolvable:$true] %s1348_s22 }
 0x598   : > { %s1734_s25 = sshra.s32 %s1349_s22, 4  ;;  %s1735_s25 = int_to_ptr.hbm [resolvable:$true] %s1734_s25 }
 0x599   : > { %s1736_s17 = scalar_lea.hbm %s1735_s25, 8  ;;  %p1741_p3 = scmp.lt.s32.totalorder %s1735_s25, %s2175_s14 }
 0x59a   : > { %p1737_p0 = scmp.ne.s32.totalorder %s1735_s25, %s1736_s17 }
 0x59c   : > { %p1738_p1 = pnand %p1737_p0, %p1915_p5 }
 0x59e   : > { %p1739_p2 = pneg %p1738_p1 }
 0x5de   : > { %v1006_v18 = vpop.xlane.xlu1 %1005 }
 0x5df   : > { %1650 = vrcp.f32 %v1006_v18 }
 0x5e5   : > { %v1651_v28 = vpop.eup %1650 }
 0x5e6   : > { %v1008_v30 = vmul.f32 %v1651_v28, %v1647_v21 }
 0x5e8   : > { %v1009_v34 = vpack.c.bf16 %v1008_v30, %v1008_v30 }
 0x5ee   : > { %v1077_v27 = vpop.xlane.xlu0 %1076 }
 0x5ef   : > { %1652 = vrcp.f32 %v1077_v27 }
 0x5f5   : > { %v1653_v29 = vpop.eup %1652 }
 0x5f6   : > { %v1079_v31 = vmul.f32 %v1653_v29, %v1649_v26 }
 0x5f8   : > { %v1080_v35 = vpack.c.bf16 %v1079_v31, %v1079_v31 }
 0x601   : > { %v1012_v32 = vpop.permute.xlu0 %1011 }
 0x602   : > { %v1017_v33 = vsel %vm797_vm5, %v1012_v32, 0 }
 0x603   : > { %1026 = vmatpush.bf16.msrb.mxu2 %v1017_v33  ;;  %1091 = vmatpush.bf16.msra.mxu1 %v1017_v33 }
 0x606   : > { %1475 = vmatmul.msk.bf16.vlgmr.msrb.gmra.mxu2 %vm781_vm9, %v1009_v34  ;;  %1478 = vmatmul.msk.bf16.vlgmr.msra.gmra.mxu1 %vm781_vm9, %v1080_v35 }
 0x607   : > { %1140 = vmatpush.bf16.msra.mxu2 %v1550_v39  ;;  %1318 = vmatpush.bf16.msrb.mxu1 %v1562_v7 }
 0x609   : > { %v1099_v41 = vpop.permute.xlu0 %1098 }
 0x60a   : > { %v1109_v43 = vsel %vm781_vm9, %v2050_v60, %v1099_v41 }
 0x60b   : > { %1141 = vmatpush.bf16.msra.mxu2 %v1549_v40  ;;  %1319 = vmatpush.bf16.msrb.mxu1 %v1561_v8 }
 0x60f   : > { %1320 = vmatpush.bf16.msrb.mxu1 %v1560_v9 }
 0x613   : > { %1321 = vmatpush.bf16.msrb.mxu1 %v1559_v10 }
 0x617   : > { %1322 = vmatpush.bf16.msrb.mxu1 %v1558_v11 }
 0x61b   : > { %1323 = vmatpush.bf16.msrb.mxu1 %v1557_v12 }
 0x61f   : > { %1324 = vmatpush.bf16.msrb.mxu1 %v1556_v14 }
 0x623   : > { %1325 = vmatpush.bf16.msrb.mxu1 %v1555_v16 }
 0x683   : > { %v1093_v47 = vpop.f32.mrf.mxu1 }
 0x689   : > { %v1028_v36 = vpop.f32.mrf.mxu2 }
 0x68a   : > { %1102 = vrot.lane.b32.xlu0 %v1028_v36, %s1795_s27 }
 0x68b   : > { %v1095_v37 = vpop.f32.mrf.mxu1 }
 0x691   : > { %v1030_v38 = vpop.f32.mrf.mxu2 }
 0x692   : > { %1106 = vrot.lane.b32.xlu0 %v1093_v47, %s1801_s18  ;;  %s1438_s18 = sshll.u32 %s486_s26, 3 }
 0x693   : > { %s488_s15 = scalar_lea.vmem [#allocation7], %s1438_s18  ;;  %s1740_s18 = scalar_lea.hbm %s2175_s14, 16 }
 0x694   : > { %s1346_s27 = sshll.u32 %s488_s15, 4  ;;  %p1742_p4 = scmp.lt.s32.totalorder %s1740_s18, %s1736_s17  ;;  %s1347_s27 = int_to_ptr.vmem [resolvable:$true] %s1346_s27 }
 0x696   : > { %p1743_p7 = por %p1742_p4, %p1741_p3 }
 0x698   : > { %p1744_p8 = pnand %p1743_p7, %p1739_p2 }
 0x6fc   : > { %v1103_v42 = vpop.permute.xlu0 %1102 }
 0x6fd   : > { %v1111_v44 = vsel %vm1110_vm10, %v1109_v43, %v1103_v42 }
 0x704   : > { %v1107_v45 = vpop.permute.xlu0 %1106 }
 0x705   : > { %v1113_v46 = vsel %vm1112_vm11, %v1111_v44, %v1107_v45 }
 0x706   : > { %v1114_v48 = vpack.c.bf16 %v1113_v46, %v1113_v46 }
 0x708   : > { %1487 = vmatmul.msk.bf16.vlgmr.msra.gmra.mxu2 %vm497_vm0, %v1114_v48 }
 0x78b   : > { %v1143_v49 = vpop.f32.mrf.mxu2 }
 0x78c   : > { %v2079_v50 = vadd.f32 %v1143_v49, %v1955_v0  ;;  %v1551_v0 = vld [vmem:[%s2172_s11] sm:$0xff] }
 0x78d   : > { %1197 = vmatpush.bf16.msra.mxu3 %v1551_v0 }
 0x78e   : > { %v1149_v51 = vmul.f32 %v2079_v50, %v2079_v50 }
 0x790   : > { %v1150_v52 = vsel %vm497_vm0, %v1149_v51, 0.0 }
 0x791   : > { %1151 = vadd.xlane.f32.xlu0 %v1150_v52 }
 0x793   : > { %v1145_v53 = vpop.f32.mrf.mxu2 }
 0x804   : > { %v1152_v57 = vpop.xlane.xlu0 %1151 }
 0x805   : > { %v1153_v58 = vmul.f32 %v1152_v57, %v1980_v15 }
 0x807   : > { %v1154_v59 = vadd.f32 1e-05, %v1153_v58 }
 0x809   : > { %1654 = vrsqrt.f32 %v1154_v59  ;;  %vm1161_vm13 = vweird.f32 %v1154_v59 }
 0x80f   : > { %v1655_v60 = vpop.eup %1654 }
 0x810   : > { %v1156_v61 = vmul.f32 %v1655_v60, %v1154_v59  ;;  %vm1162_vm12 = vweird.f32 %v1655_v60 }
 0x811   : > { %vm1163_vm14 = vmor %vm1161_vm13, %vm1162_vm12 }
 0x812   : > { %v1157_v62 = vmul.f32 %v1655_v60, %v1156_v61 }
 0x814   : > { %v1158_v63 = vmul.f32 0.5, %v1157_v62 }
 0x816   : > { %v1159_v1 = vsub.f32 1.5, %v1158_v63 }
 0x818   : > { %v1160_v2 = vmul.f32 %v1655_v60, %v1159_v1 }
 0x81a   : > { %v1164_v4 = vsel %vm1163_vm14, %v1655_v60, %v1160_v2 }
 0x81b   : > { %v1165_v5 = vmul.f32 %v1164_v4, %v2079_v50 }
 0x81d   : > { %v1169_v6 = vmul.f32 %v1633_v3, %v1165_v5 }
 0x81f   : > { %v1170_v15 = vpack.c.bf16 %v1169_v6, %v1169_v6 }
 0x821   : > { %1496 = vmatmul.msk.bf16.vlgmr.msra.gmra.mxu3 %vm497_vm0, %v1170_v15  ;;  %1505 = vmatmul.msk.bf16.vlgmr.msra.gmra.mxu0 %vm497_vm0, %v1170_v15 }
 0x89e   : > { %v1228_v13 = vpop.f32.mrf.mxu0 }
 0x8a4   : > { %v1199_v19 = vpop.f32.mrf.mxu3 }
 0x8a5   : > { %v1506_v20 = vmul.f32 -1.442695, %v1199_v19 }
 0x8a6   : > { %v1230_v21 = vpop.f32.mrf.mxu0 }
 0x8a7   : > { %1656 = vpow2.f32 %v1506_v20 }
 0x8ac   : > { %v1201_v22 = vpop.f32.mrf.mxu3 }
 0x8ad   : > { %v1657_v23 = vpop.eup %1656 }
 0x8ae   : > { %v1235_v24 = vadd.f32 1.0, %v1657_v23 }
 0x8b0   : > { %1658 = vrcp.f32 %v1235_v24  ;;  %v1247_v18 = vand.u32 2147483648, %v1235_v24  ;;  %v1245_v28 = vand.u32 2147483647, %v1235_v24  ;;  %vm1241_vm1 = vweird.f32 %v1235_v24 }
 0x8b2   : > { %v1248_v30 = vor.u32 1.1754944e-38, %v1247_v18  ;;  %vm1246_vm3 = vcmp.eq.f32.partialorder %v1245_v28, 8.507059e+37 }
 0x8b6   : > { %v1659_v25 = vpop.eup %1658 }
 0x8b7   : > { %v1237_v26 = vmul.f32 %v1659_v25, %v1235_v24  ;;  %vm1242_vm15 = vweird.f32 %v1659_v25 }
 0x8b8   : > { %vm1243_vm2 = vmor %vm1241_vm1, %vm1242_vm15 }
 0x8b9   : > { %v1238_v17 = vsub.f32 1.0, %v1237_v26 }
 0x8bb   : > { %v1239_v27 = vmul.f32 %v1659_v25, %v1238_v17 }
 0x8bd   : > { %v1240_v29 = vadd.f32 %v1659_v25, %v1239_v27 }
 0x8bf   : > { %v1244_v31 = vsel %vm1243_vm2, %v1659_v25, %v1240_v29 }
 0x8c0   : > { %v1249_v32 = vsel %vm1246_vm3, %v1248_v30, %v1244_v31 }
 0x8c1   : > { %v1251_v33 = vmul.f32 %v1249_v32, %v1199_v19 }
 0x8c3   : > { %v1252_v34 = vmul.f32 %v1251_v33, %v1228_v13 }
 0x8c5   : > { %v1253_v35 = vpack.c.bf16 %v1252_v34, %v1252_v34 }
 0x8c7   : > { %1326 = vmatmul.bf16.vlgmr.msrb.gmra.mxu1 %v1253_v35 }
 0x944   : > { %v1327_v47 = vpop.f32.mrf.mxu1 }
 0x945   : > { %v1331_v36 = vadd.f32 %v1327_v47, %v2079_v50 }
 0x947   : > { %1332 = vst.msk [vmem:[%s488_s15] sm:$0xff] %vm497_vm0, %v1331_v36 }
 0x948   : > { %1747 = shalt.err (!%p1744_p8)
}
 0x949   : > { %1571 = dma.vmem_to_hbm [thread:$0]  (%p1915_p5), %s1347_s27, 128, %s1349_s22, %s1334_s24  }
 0x94c   : > { %v1329_v37 = vpop.f32.mrf.mxu1 }
 0x94d PF: > { %p1588_p9 = scmp.ge.s32.totalorder %s1790_s16, 2  ;;  %s1360_s15 = sand.u32 1, %s1778_s29  }
 0x94e   : > { %s1361_s20 = scalar_lea.sflag [#allocation4], %s1360_s15 }
 0x94f   : > { %p1581_p10 = pnand %p1588_p9, %p1919_p6 }
 0x951   : > { %p1582_p11 = pneg %p1581_p10 }
 0x953   : > { %1773 = dma.done.wait (%p1582_p11), %s1361_s20, 128  }
 0x954   : > { %1775 = vsyncadd (%p1582_p11), %s1361_s20, 4294967168  ;;  %s2188_s16 = sld [smem:[#allocation12_spill]]  ;;  %s2191_s29 = smov %s1782_s30 }
 0x955   : > { %s2189_s25 = sld [smem:[#allocation11_spill]] }
 0x956   : > { %s2190_s15 = sld [smem:[#allocation13_spill]] }
 0x95a   : > { %p26_p12 = scmp.ge.s32.totalorder %s2188_s16, 4  }
 0x95b   : > { %s2192_s30 = smov %s2189_s25 }
 0x95c   :  { %28 = sbr.rel (!%p26_p12) target bundleno = 5 (0x5), region = 120 }
 0x961   :  { %1367 = vsyncpa [#allocation3], 1 }
 0x962   :  { %1369 = vsyncpa [#allocation3 + $0x1], 1 }
 0x963   :  { %1370 = vsyncpa [#allocation6], 1 }
 0x964   :  { %1371 = vsyncpa [#allocation4], 1 }
 0x965   :  { %1373 = vsyncpa [#allocation4 + $0x1], 1 }

</bundles_post_ra>
